<compile_context>
chip_gen: v5e
topology: v5e:2x2
jax: 0.10.0
libtpu: 0.0.40
codegen_flags: <defaults>
</compile_context>

<pallas_src>
import math
from functools import partial

import jax
import jax.numpy as jnp
from jax import lax
from jax.experimental import pallas as pl
from jax.experimental.pallas import tpu as pltpu

TEMPERATURE = 0.07  # cfg.LOSS.TEMPERATURE stand-in (SimCLR default)
N_VIEWS = 2


def _prep_kernel(f_ref, fn_ref, pos_ref, *, half):
    """Normalize rows, fold temperature, emit bf16 features + f32 positives."""
    f = f_ref[...].astype(jnp.float32)
    ss = jnp.sum(f * f, axis=1, keepdims=True)
    # torch F.normalize clamps ||x|| at 1e-12  <=>  clamp ||x||^2 at 1e-24.
    inv_norm = lax.rsqrt(jnp.maximum(ss, jnp.float32(1e-24)))
    scale = jnp.float32(1.0 / math.sqrt(TEMPERATURE))  # 1/sqrt(T) on both operands
    fn = f * (inv_norm * scale)
    # Positive logit: pos[i] = <fn[i], fn[(i+half) mod N]>.  Since N = 2*half,
    # a roll by `half` in either direction gives the partner row (XLU op).
    partner = pltpu.roll(fn, shift=half, axis=0)
    pos_ref[...] = jnp.sum(fn * partner, axis=1, keepdims=True)
    fn_ref[...] = fn.astype(jnp.bfloat16)


def _lse_kernel(fq_ref, fk_ref, pos_ref, out_ref, m_ref, l_ref, s_ref):
    """Tiled online logsumexp over off-diagonal logits; per-row CE loss."""
    qi = pl.program_id(0)
    ki = pl.program_id(1)

    @pl.when(ki == 0)
    def _init():
        m_ref[...] = jnp.full_like(m_ref, -jnp.inf)
        l_ref[...] = jnp.zeros_like(l_ref)

    # (TQ, TK) logits tile: contract D on both sides -> no transpose copy,
    # bf16 operands / f32 accumulation on the MXU.  Temperature is already
    # folded into the features.
    s_ref[...] = lax.dot_general(
        fq_ref[...], fk_ref[...],
        dimension_numbers=(((1,), (1,)), ((), ())),
        preferred_element_type=jnp.float32,
    )

    # Drop self-similarity only on diagonal tiles (TQ == TK).
    @pl.when(qi == ki)
    def _mask_diag():
        r = lax.broadcasted_iota(jnp.int32, s_ref.shape, 0)
        c = lax.broadcasted_iota(jnp.int32, s_ref.shape, 1)
        s_ref[...] = jnp.where(r == c, jnp.float32(-1e30), s_ref[...])

    s = s_ref[...]
    m_prev = m_ref[...]
    m_new = jnp.maximum(m_prev, jnp.max(s, axis=1, keepdims=True))
    alpha = jnp.exp(m_prev - m_new)
    l_ref[...] = alpha * l_ref[...] + jnp.sum(jnp.exp(s - m_new), axis=1,
                                              keepdims=True)
    m_ref[...] = m_new

    @pl.when(ki == pl.num_programs(1) - 1)
    def _finalize():
        lse = m_ref[...] + jnp.log(l_ref[...])
        out_ref[...] = lse - pos_ref[...]


def _pick_tile(n):
    # 256-aligned tiles preferred (MXU on v6e/v7x), fall back to smaller
    # divisors, and finally to a single full-extent tile (always legal).
    for t in (512, 256, 128, 64, 32, 16):
        if n % t == 0:
            return t
    return n


def contrastive_loss(preds, labels=None):
    """preds: [N, D] features (N = 2 * batch).  `labels` is ignored, matching
    the PyTorch _info_nce_loss which rebuilds labels internally."""
    del labels
    n, d = preds.shape
    assert n % N_VIEWS == 0, "feature count must be n_views * batch"
    half = n // N_VIEWS

    # Lane axis (D) must be a multiple of 128 for unmasked loads / full MXU K.
    dp = ((d + 127) // 128) * 128
    if dp != d:
        preds = jnp.pad(preds, ((0, 0), (0, dp - d)))

    # ---- prep: normalize + fold 1/sqrt(T) + bf16 cast + positive logits ----
    fn_bf16, pos = pl.pallas_call(
        partial(_prep_kernel, half=half),
        out_shape=(
            jax.ShapeDtypeStruct((n, dp), jnp.bfloat16),
            jax.ShapeDtypeStruct((n, 1), jnp.float32),
        ),
        in_specs=[pl.BlockSpec((n, dp), lambda: (0, 0))],
        out_specs=(
            pl.BlockSpec((n, dp), lambda: (0, 0)),
            pl.BlockSpec((n, 1), lambda: (0, 0)),
        ),
        compiler_params=pltpu.CompilerParams(
            vmem_limit_bytes=64 * 1024 * 1024),
    )(preds)

    # ---- main: tiled online logsumexp over the off-diagonal logits ---------
    tile = _pick_tile(n)
    grid = (n // tile, n // tile)
    cost = pl.CostEstimate(
        flops=2 * n * n * dp,
        transcendentals=n * n,
        bytes_accessed=grid[0] * n * dp * 2 + n * dp * 2 + 3 * n * 4,
    )
    per_row = pl.pallas_call(
        _lse_kernel,
        out_shape=jax.ShapeDtypeStruct((n, 1), jnp.float32),
        grid_spec=pltpu.PrefetchScalarGridSpec(
            num_scalar_prefetch=0,
            grid=grid,
            in_specs=[
                pl.BlockSpec((tile, dp), lambda qi, ki: (qi, 0)),  # row tile
                pl.BlockSpec((tile, dp), lambda qi, ki: (ki, 0)),  # col tile
                pl.BlockSpec((tile, 1), lambda qi, ki: (qi, 0)),   # positives
            ],
            out_specs=pl.BlockSpec((tile, 1), lambda qi, ki: (qi, 0)),
            scratch_shapes=[
                pltpu.VMEM((tile, 1), jnp.float32),     # running max
                pltpu.VMEM((tile, 1), jnp.float32),     # running sum
                pltpu.VMEM((tile, tile), jnp.float32),  # logits tile
            ],
        ),
        compiler_params=pltpu.CompilerParams(
            dimension_semantics=("parallel", "arbitrary"),
            vmem_limit_bytes=64 * 1024 * 1024,
        ),
        cost_estimate=cost,
    )(fn_bf16, fn_bf16, pos)

    # Mean over N per-row losses (trivial O(N) epilogue).
    return jnp.mean(per_row)


def _reference_loss(preds):
    # Pure-JAX f32 reference of the same math (in-script sanity check).
    f = preds.astype(jnp.float32)
    n = f.shape[0]
    b = n // N_VIEWS
    fn = f / jnp.maximum(jnp.linalg.norm(f, axis=1, keepdims=True), 1e-12)
    sim = fn @ fn.T / TEMPERATURE
    idx = jnp.arange(n)
    diag = idx[:, None] == idx[None, :]
    partner = idx[None, :] == ((idx[:, None] + b) % n)
    masked = jnp.where(diag, -jnp.inf, sim)
    lse = jax.scipy.special.logsumexp(masked, axis=1)
    pos = jnp.sum(jnp.where(partner, sim, 0.0), axis=1)
    return jnp.mean(lse - pos)


if __name__ == "__main__":
    key = jax.random.PRNGKey(0)
    batch, hidden = 4, 32
    n = N_VIEWS * batch  # 8 feature rows (two views per sample)

    kf, kl = jax.random.split(key)
    preds = jax.random.normal(kf, (n, hidden), dtype=jnp.float32)
    labels = jax.random.randint(kl, (n,), 0, 10)  # unused, matches forward sig

    loss = contrastive_loss(preds, labels)
    jax.block_until_ready(loss)

    ref = _reference_loss(preds)
    # bf16 MXU inputs (f32 accumulation) -> slightly relaxed tolerance vs f32 ref.
    assert jnp.allclose(loss, ref, rtol=5e-2, atol=5e-2), (loss, ref)

    print("KERNEL_OK")
</pallas_src>

<mosaic_0001>
module attributes {stable_mosaic.version = 11 : i64} {
  func.func @_prep_kernel(%arg0: memref<8x128xf32, #tpu.memory_space<vmem>>, %arg1: memref<8x128xbf16, #tpu.memory_space<vmem>>, %arg2: memref<8x1xf32, #tpu.memory_space<vmem>>) attributes {dimension_semantics = [], scalar_prefetch = 0 : i64, scratch_operands = 0 : i64, tpu.core_type = #tpu.core_type<tc>} {
    %c0 = arith.constant 0 : index
    %c0_0 = arith.constant 0 : index
    %0 = vector.load %arg0[%c0, %c0_0] : memref<8x128xf32, #tpu.memory_space<vmem>>, vector<8x128xf32>
    %1 = arith.mulf %0, %0 : vector<8x128xf32>
    %cst = arith.constant dense<0.000000e+00> : vector<8xf32>
    %2 = vector.multi_reduction <add>, %1, %cst [1] : vector<8x128xf32> to vector<8xf32>
    %3 = vector.shape_cast %2 : vector<8xf32> to vector<8x1xf32>
    %cst_1 = arith.constant 1.000000e-24 : f32
    %4 = vector.broadcast %cst_1 : f32 to vector<8x1xf32>
    %5 = arith.maximumf %3, %4 : vector<8x1xf32>
    %6 = math.rsqrt %5 : vector<8x1xf32>
    %cst_2 = arith.constant 3.77964473 : f32
    %7 = vector.broadcast %cst_2 : f32 to vector<8x1xf32>
    %8 = arith.mulf %6, %7 : vector<8x1xf32>
    %9 = vector.broadcast %8 : vector<8x1xf32> to vector<8x128xf32>
    %10 = arith.mulf %0, %9 : vector<8x128xf32>
    %c4_i32 = arith.constant 4 : i32
    %11 = tpu.dynamic_rotate %10 by %c4_i32 dim 0 : vector<8x128xf32>, i32 -> vector<8x128xf32>
    %12 = arith.mulf %10, %11 : vector<8x128xf32>
    %cst_3 = arith.constant dense<0.000000e+00> : vector<8xf32>
    %13 = vector.multi_reduction <add>, %12, %cst_3 [1] : vector<8x128xf32> to vector<8xf32>
    %14 = vector.shape_cast %13 : vector<8xf32> to vector<8x1xf32>
    %c0_4 = arith.constant 0 : index
    %c0_5 = arith.constant 0 : index
    %15 = vector.load %arg2[%c0_4, %c0_5] : memref<8x1xf32, #tpu.memory_space<vmem>>, vector<8x1xf32>
    tpu.vector_store %arg2[%c0_4, %c0_5], %14 {strides = array<i32>} : memref<8x1xf32, #tpu.memory_space<vmem>>, vector<8x1xf32>,
    %16 = arith.truncf %10 : vector<8x128xf32> to vector<8x128xbf16>
    %c0_6 = arith.constant 0 : index
    %c0_7 = arith.constant 0 : index
    %17 = vector.load %arg1[%c0_6, %c0_7] : memref<8x128xbf16, #tpu.memory_space<vmem>>, vector<8x128xbf16>
    tpu.vector_store %arg1[%c0_6, %c0_7], %16 {strides = array<i32>} : memref<8x128xbf16, #tpu.memory_space<vmem>>, vector<8x128xbf16>,
    return
  }
}

</mosaic_0001>

<bundles_post_ra>
// kernel: tpu_custom_call.1
= control target key start
LH: loop header
LB: loop body
LE: loop exit
PB: predicated region body
PF: predicated region fallthrough
CT: control target
= control target key end

     0   :  { %8 = vsyncpa [#allocation3], 0  ;;  %s153_s0 = inlined_call_operand.hbm [shape: f32[8,128], index: 0, kind: input, shape index: {}]   ;;  %s154_s1 = inlined_call_operand.hbm [shape: bf16[8,128], index: 1, kind: output, shape index: {0}]   ;;  %s155_s2 = inlined_call_operand.vmem [shape: f32[8,1], index: 2, kind: output, shape index: {1}]  }
   0x1   :  { %9 = vsyncpa [#allocation4], 0  ;;  %s15_s11 = sshll.u32 %s153_s0, 4  ;;  %s127_s12 = smov [#allocation2]   ;;  %s16_s11 = int_to_ptr.hbm [resolvable:$true] %s15_s11 }
   0x2   :  { %s17_s13 = sshll.u32 %s127_s12, 4  ;;  %s18_s13 = int_to_ptr.vmem [resolvable:$true] %s17_s13 }
   0x3   :  { %20 = dma.hbm_to_vmem [thread:$0]  %s16_s11, 128, %s18_s13, [#allocation3]  }
   0x4   :  { %123 = dma.done.wait [#allocation3], 128  }
   0x5   :  { %124 = vsyncadd [#allocation3], 4294967168  ;;  %v25_v0 = vld [vmem:[#allocation2] sm:$0xff]  ;;  %s128_s0 = smov [#allocation5]   ;;  %s57_s17 = sshll.u32 %s154_s1, 4  ;;  %vm46_vm3 = vcmask 7168   ;;  %s58_s17 = int_to_ptr.hbm [resolvable:$true] %s57_s17 }
   0x6   :  { %v26_v1 = vmul.f32 %v25_v0, %v25_v0  ;;  %s55_s14 = sshll.u32 %s128_s0, 4  ;;  %s56_s14 = int_to_ptr.vmem [resolvable:$true] %s55_s14 }
   0x8   :  { %27 = vadd.xlane.f32.xlu0 %v26_v1 }
  0x7b   :  { %v28_v2 = vpop.xlane.xlu0 %27 }
  0x7c   :  { %v29_v3 = vmax.f32 %v28_v2, 1e-24 }
  0x7e   :  { %73 = vrsqrt.f32 %v29_v3  ;;  %vm36_vm1 = vweird.f32 %v29_v3 }
  0x84   :  { %v74_v4 = vpop.eup %73 }
  0x85   :  { %v31_v5 = vmul.f32 %v74_v4, %v29_v3  ;;  %vm37_vm0 = vweird.f32 %v74_v4 }
  0x86   :  { %vm38_vm2 = vmor %vm36_vm1, %vm37_vm0 }
  0x87   :  { %v32_v6 = vmul.f32 %v74_v4, %v31_v5 }
  0x89   :  { %v33_v7 = vmul.f32 0.5, %v32_v6 }
  0x8b   :  { %v34_v8 = vsub.f32 1.5, %v33_v7 }
  0x8d   :  { %v35_v9 = vmul.f32 %v74_v4, %v34_v8 }
  0x8f   :  { %v39_v10 = vsel %vm38_vm2, %v74_v4, %v35_v9 }
  0x90   :  { %v40_v11 = vmul.f32 3.7796447, %v39_v10 }
  0x92   :  { %v41_v12 = vmul.f32 %v40_v11, %v25_v0 }
  0x94   :  { %v42_v13 = vrot.slane %v41_v12, 4  ;;  %v48_v14 = vpack.c.bf16 %v41_v12, %v41_v12 }
  0x96   :  { %v43_v15 = vmul.f32 %v42_v13, %v41_v12  ;;  %49 = vst [vmem:[#allocation5] sm:$0xf] %v48_v14 }
  0x97   :  { %60 = dma.vmem_to_hbm [thread:$0]  %s56_s14, 64, %s58_s17, [#allocation4]  }
  0x98   :  { %44 = vadd.xlane.f32.xlu0 %v43_v15 }
 0x10b   :  { %v45_v16 = vpop.xlane.xlu0 %44 }
 0x10c   :  { %47 = vst.msk [vmem:[%s155_s2] sm:$0xff] %vm46_vm3, %v45_v16 }
 0x10d   :  { %125 = dma.done.wait [#allocation4], 64  }
 0x10e   :  { %126 = vsyncadd [#allocation4], 4294967232 }
 0x10f   :  { %69 = vsyncpa [#allocation3], 1 }
 0x110   :  { %70 = vsyncpa [#allocation4], 1 }

</bundles_post_ra>
